<compile_context>
chip_gen: v5e
topology: v5e:2x2
jax: 0.10.0
libtpu: 0.0.40
codegen_flags: <defaults>
</compile_context>

<pallas_src>
import functools

import jax
import jax.numpy as jnp
from jax import lax
from jax.experimental import pallas as pl
from jax.experimental.pallas import tpu as pltpu

ALPHA = 0.5
BETA = 0.5
SMOOTH = 1.0


def _pad_sublanes(rows, itemsize):
    """Rows occupied in VMEM after (8*packing, 128) tiling."""
    mult = 8 * max(1, 4 // itemsize)
    return ((rows + mult - 1) // mult) * mult


def _pick_tile(num_classes, hw, x_itemsize, t_itemsize,
               target_block_bytes=2 * 1024 * 1024,
               vmem_input_budget=28 * 1024 * 1024):
    """Largest useful lane tile (multiple of 128)."""
    # ~2 MiB of logits per block: enough to amortize the ~0.35 us/step grid
    # overhead and sit on the HBM roofline on v5e/v6e/v7x.
    tile = max(128, target_block_bytes // (num_classes * x_itemsize))
    # Respect a v7x-safe (64 MiB physical VMEM) double-buffered input budget,
    # including sublane padding of the small-C logits and the (1, tile) targets.
    per_lane = 2 * (_pad_sublanes(num_classes, x_itemsize) * x_itemsize
                    + _pad_sublanes(1, t_itemsize) * t_itemsize)
    tile = min(tile, vmem_input_budget // per_lane)
    tile = max(128, (tile // 128) * 128)
    hw_128 = ((hw + 127) // 128) * 128
    return min(tile, hw_128)


def _vmem_limit_bytes(num_classes, tile, x_itemsize, t_itemsize):
    """Explicit scoped-VMEM request: double-buffered inputs + headroom."""
    x_blk = _pad_sublanes(num_classes, x_itemsize) * tile * x_itemsize
    t_blk = _pad_sublanes(1, t_itemsize) * tile * t_itemsize
    need = 2 * (x_blk + t_blk) + 4 * 1024 * 1024  # outputs/scratch/slack
    # Never below a comfortable floor, never above a v7x-safe 48 MiB cap.
    return int(min(48 * 1024 * 1024, max(need, 24 * 1024 * 1024)))


def _tversky_kernel(x_ref, t_ref, tp_ref, sp_ref, cnt_ref,
                    tp_acc, sp_acc, cnt_acc,
                    *, hw, tile, tiles_per_core):
    """Grid = (ncores, N, tiles_per_core); per-(core, image) partial sums."""
    core = pl.program_id(0)
    i = pl.program_id(2)

    @pl.when(i == 0)
    def _():
        tp_acc[...] = jnp.zeros_like(tp_acc)
        sp_acc[...] = jnp.zeros_like(sp_acc)
        cnt_acc[...] = jnp.zeros_like(cnt_acc)

    x = x_ref[...].astype(jnp.float32)      # (C, TILE) logits (native dtype DMA)
    t = t_ref[...].astype(jnp.int32)        # (1, TILE) class ids

    # Softmax over the class (sublane) axis.  EUP approximate reciprocal plus
    # one Newton-Raphson step (acts on a (1, TILE) row -> ~free) keeps ~f32
    # accuracy while staying off the VPU divide path.
    m = jnp.max(x, axis=0, keepdims=True)
    e = jnp.exp(x - m)
    s = jnp.sum(e, axis=0, keepdims=True)
    s_inv = pl.reciprocal(s, approx=True)
    s_inv = s_inv * (2.0 - s * s_inv)
    p = e * s_inv                            # (C, TILE) softmax probs

    cls_ids = lax.broadcasted_iota(jnp.int32, p.shape, 0)
    onehot = cls_ids == t                    # (C, TILE) bool, no float one-hot
    zero = jnp.zeros_like(p)

    # First pixel covered by this block (unclamped; the DMA block index is
    # clamped separately, so a fully out-of-range "phantom" step adds zero).
    start = (core * tiles_per_core + i) * tile
    is_full = start + tile <= hw

    @pl.when(is_full)
    def _():
        # Hot path: tile fully inside the image, no validity mask needed.
        tp_acc[...] += jnp.sum(jnp.where(onehot, p, zero), axis=1, keepdims=True)
        sp_acc[...] += jnp.sum(p, axis=1, keepdims=True)
        cnt_acc[...] += jnp.sum(onehot.astype(jnp.float32), axis=1, keepdims=True)

    @pl.when(jnp.logical_not(is_full))
    def _():
        # Ragged tail (or phantom step): mask lanes beyond the image.
        lane = lax.broadcasted_iota(jnp.int32, (1, tile), 1)
        valid = (lane + start) < hw
        ohv = jnp.logical_and(onehot, valid)
        tp_acc[...] += jnp.sum(jnp.where(ohv, p, zero), axis=1, keepdims=True)
        sp_acc[...] += jnp.sum(jnp.where(valid, p, zero), axis=1, keepdims=True)
        cnt_acc[...] += jnp.sum(ohv.astype(jnp.float32), axis=1, keepdims=True)

    @pl.when(i == pl.num_programs(2) - 1)
    def _():
        tp_ref[...] = tp_acc[...][None, None]
        sp_ref[...] = sp_acc[...][None, None]
        cnt_ref[...] = cnt_acc[...][None, None]


def tversky_loss(inputs, targets, *, alpha=ALPHA, beta=BETA, smooth=SMOOTH,
                 tile_override=None):
    """inputs: (N, C, H, W) float logits, targets: (N, H, W) int class ids."""
    N, C, H, W = inputs.shape
    HW = H * W

    # Free reshapes only -- no pad, no dtype copies materialized in HBM.
    x = inputs.reshape(N, C, HW)
    t = targets.reshape(N, 1, HW)
    if (not jnp.issubdtype(t.dtype, jnp.integer)) or t.dtype.itemsize > 4:
        t = t.astype(jnp.int32)

    x_isz = x.dtype.itemsize
    t_isz = t.dtype.itemsize
    tile = tile_override if tile_override is not None else _pick_tile(
        C, HW, x_isz, t_isz)
    num_tiles = pl.cdiv(HW, tile)
    # Leading core axis keeps both v7x TensorCores busy even at N == 1
    # (harmless no-op on single-TC v5e/v6e).
    ncores = 2 if num_tiles >= 2 else 1
    tiles_per_core = pl.cdiv(num_tiles, ncores)

    def pix_block(core, i):
        # Clamp so an odd tile count never issues an out-of-range block DMA;
        # the phantom step is fully masked inside the kernel.
        return jnp.minimum(core * tiles_per_core + i, num_tiles - 1)

    x_spec = pl.BlockSpec((pl.Squeezed(), C, tile),
                          lambda c, n, i: (n, 0, pix_block(c, i)))
    t_spec = pl.BlockSpec((pl.Squeezed(), 1, tile),
                          lambda c, n, i: (n, 0, pix_block(c, i)))
    out_spec = pl.BlockSpec((1, 1, C, 1), lambda c, n, i: (c, n, 0, 0))
    part_shape = jax.ShapeDtypeStruct((ncores, N, C, 1), jnp.float32)

    kernel = functools.partial(_tversky_kernel, hw=HW, tile=tile,
                               tiles_per_core=tiles_per_core)

    tp, sp, cnt = pl.pallas_call(
        kernel,
        out_shape=(part_shape, part_shape, part_shape),
        grid_spec=pltpu.PrefetchScalarGridSpec(
            num_scalar_prefetch=0,
            grid=(ncores, N, tiles_per_core),
            in_specs=[x_spec, t_spec],
            out_specs=(out_spec, out_spec, out_spec),
            scratch_shapes=[
                pltpu.VMEM((C, 1), jnp.float32),  # TP accumulator
                pltpu.VMEM((C, 1), jnp.float32),  # sum(p) accumulator
                pltpu.VMEM((C, 1), jnp.float32),  # one-hot count accumulator
            ],
        ),
        compiler_params=pltpu.CompilerParams(
            dimension_semantics=("parallel", "parallel", "arbitrary"),
            vmem_limit_bytes=_vmem_limit_bytes(C, tile, x_isz, t_isz)),
        cost_estimate=pl.CostEstimate(
            flops=10 * C * N * HW,
            transcendentals=C * N * HW,
            bytes_accessed=N * HW * (C * x_isz + t_isz)),
    )(x, t)

    # Tiny finalization in plain JAX (matches the PyTorch module exactly).
    tp = jnp.sum(tp, axis=(0, 1))[:, 0]          # (C,)
    sp = jnp.sum(sp, axis=(0, 1))[:, 0]
    cnt = jnp.sum(cnt, axis=(0, 1))[:, 0]
    fp = sp - tp                                 # (1 - one_hot) * p summed
    fn = cnt - tp                                # one_hot * (1 - p) summed
    tversky = (tp + smooth) / (tp + alpha * fp + beta * fn + smooth)
    return 1.0 - jnp.mean(tversky)


def _tversky_loss_ref(inputs, targets, *, alpha=ALPHA, beta=BETA, smooth=SMOOTH):
    p = jax.nn.softmax(inputs.astype(jnp.float32), axis=1)
    C = inputs.shape[1]
    oh = jnp.transpose(jax.nn.one_hot(targets, C, dtype=jnp.float32),
                       (0, 3, 1, 2))
    tp = jnp.sum(p * oh, axis=(0, 2, 3))
    fp = jnp.sum((1.0 - oh) * p, axis=(0, 2, 3))
    fn = jnp.sum(oh * (1.0 - p), axis=(0, 2, 3))
    tv = (tp + smooth) / (tp + alpha * fp + beta * fn + smooth)
    return 1.0 - jnp.mean(tv)


if __name__ == "__main__":
    key = jax.random.PRNGKey(0)
    k1, k2, k3, k4, k5, k6 = jax.random.split(key, 6)

    # Case 1: even spatial size (single full tile).
    N, C, H, W = 2, 4, 16, 16
    x1 = jax.random.normal(k1, (N, C, H, W), dtype=jnp.float32)
    t1 = jax.random.randint(k2, (N, H, W), 0, C, dtype=jnp.int32)
    l1 = jax.block_until_ready(tversky_loss(x1, t1))
    r1 = jax.block_until_ready(_tversky_loss_ref(x1, t1))
    assert jnp.allclose(l1, r1, rtol=1e-4, atol=1e-4), (l1, r1)

    # Case 2: odd spatial size -> ragged (masked) tile, no wrapper-side pad.
    x2 = jax.random.normal(k3, (2, 4, 13, 11), dtype=jnp.float32)
    t2 = jax.random.randint(k4, (2, 13, 11), 0, 4, dtype=jnp.int32)
    l2 = jax.block_until_ready(tversky_loss(x2, t2))
    r2 = jax.block_until_ready(_tversky_loss_ref(x2, t2))
    assert jnp.allclose(l2, r2, rtol=1e-4, atol=1e-4), (l2, r2)

    # Case 3: force a small tile -> multi-tile accumulation, 2-way core split
    # with an odd tile count (clamped phantom step) and a ragged last tile.
    x3 = jax.random.normal(k5, (2, 3, 18, 20), dtype=jnp.float32)
    t3 = jax.random.randint(k6, (2, 18, 20), 0, 3, dtype=jnp.int32)
    l3 = jax.block_until_ready(tversky_loss(x3, t3, tile_override=128))
    r3 = jax.block_until_ready(_tversky_loss_ref(x3, t3))
    assert jnp.allclose(l3, r3, rtol=1e-4, atol=1e-4), (l3, r3)

    print("KERNEL_OK")
</pallas_src>

<mosaic_0001>
module attributes {stable_mosaic.version = 11 : i64} {
  func.func @_tversky_kernel(%arg0: i32, %arg1: i32, %arg2: i32, %arg3: memref<1x4x256xf32, #tpu.memory_space<vmem>>, %arg4: memref<1x1x256xi32, #tpu.memory_space<vmem>>, %arg5: memref<1x1x4x1xf32, #tpu.memory_space<vmem>>, %arg6: memref<1x1x4x1xf32, #tpu.memory_space<vmem>>, %arg7: memref<1x1x4x1xf32, #tpu.memory_space<vmem>>, %arg8: memref<4x1xf32, #tpu.memory_space<vmem>>, %arg9: memref<4x1xf32, #tpu.memory_space<vmem>>, %arg10: memref<4x1xf32, #tpu.memory_space<vmem>>) attributes {dimension_semantics = [#tpu.dimension_semantics<parallel>, #tpu.dimension_semantics<parallel>, #tpu.dimension_semantics<arbitrary>], iteration_bounds = array<i64: 1, 2, 1>, scalar_prefetch = 0 : i64, scratch_operands = 3 : i64, tpu.core_type = #tpu.core_type<tc>, window_params = [{transform_indices = @transform_0, window_bounds = array<i64: 1, 4, 256>}, {transform_indices = @transform_1, window_bounds = array<i64: 1, 1, 256>}, {transform_indices = @transform_2, window_bounds = array<i64: 1, 1, 4, 1>}, {transform_indices = @transform_3, window_bounds = array<i64: 1, 1, 4, 1>}, {transform_indices = @transform_4, window_bounds = array<i64: 1, 1, 4, 1>}]} {
    %c0_i32 = arith.constant 0 : i32
    %0 = arith.cmpi eq, %arg2, %c0_i32 : i32
    %1 = arith.extui %0 : i1 to i32
    %c0_i32_0 = arith.constant 0 : i32
    %2 = arith.cmpi ne, %1, %c0_i32_0 : i32
    scf.if %2 {
      %cst_15 = arith.constant 0.000000e+00 : f32
      %38 = vector.broadcast %cst_15 : f32 to vector<4x1xf32>
      %c0_16 = arith.constant 0 : index
      %c0_17 = arith.constant 0 : index
      %39 = vector.load %arg8[%c0_16, %c0_17] : memref<4x1xf32, #tpu.memory_space<vmem>>, vector<4x1xf32>
      tpu.vector_store %arg8[%c0_16, %c0_17], %38 {strides = array<i32>} : memref<4x1xf32, #tpu.memory_space<vmem>>, vector<4x1xf32>,
      %cst_18 = arith.constant 0.000000e+00 : f32
      %40 = vector.broadcast %cst_18 : f32 to vector<4x1xf32>
      %c0_19 = arith.constant 0 : index
      %c0_20 = arith.constant 0 : index
      %41 = vector.load %arg9[%c0_19, %c0_20] : memref<4x1xf32, #tpu.memory_space<vmem>>, vector<4x1xf32>
      tpu.vector_store %arg9[%c0_19, %c0_20], %40 {strides = array<i32>} : memref<4x1xf32, #tpu.memory_space<vmem>>, vector<4x1xf32>,
      %cst_21 = arith.constant 0.000000e+00 : f32
      %42 = vector.broadcast %cst_21 : f32 to vector<4x1xf32>
      %c0_22 = arith.constant 0 : index
      %c0_23 = arith.constant 0 : index
      %43 = vector.load %arg10[%c0_22, %c0_23] : memref<4x1xf32, #tpu.memory_space<vmem>>, vector<4x1xf32>
      tpu.vector_store %arg10[%c0_22, %c0_23], %42 {strides = array<i32>} : memref<4x1xf32, #tpu.memory_space<vmem>>, vector<4x1xf32>,
    } else {
    }
    %c0 = arith.constant 0 : index
    %c0_1 = arith.constant 0 : index
    %c0_2 = arith.constant 0 : index
    %3 = vector.load %arg3[%c0, %c0_1, %c0_2] : memref<1x4x256xf32, #tpu.memory_space<vmem>>, vector<1x4x256xf32>
    %4 = vector.shape_cast %3 : vector<1x4x256xf32> to vector<4x256xf32>
    %c0_3 = arith.constant 0 : index
    %c0_4 = arith.constant 0 : index
    %c0_5 = arith.constant 0 : index
    %5 = vector.load %arg4[%c0_3, %c0_4, %c0_5] : memref<1x1x256xi32, #tpu.memory_space<vmem>>, vector<1x1x256xi32>
    %6 = vector.shape_cast %5 : vector<1x1x256xi32> to vector<1x256xi32>
    %cst = arith.constant dense<0xFF800000> : vector<256xf32>
    %7 = vector.multi_reduction <maximumf>, %4, %cst [0] : vector<4x256xf32> to vector<256xf32>
    %8 = vector.shape_cast %7 : vector<256xf32> to vector<1x256xf32>
    %9 = vector.broadcast %8 : vector<1x256xf32> to vector<4x256xf32>
    %10 = arith.subf %4, %9 : vector<4x256xf32>
    %11 = math.exp %10 : vector<4x256xf32>
    %cst_6 = arith.constant dense<0.000000e+00> : vector<256xf32>
    %12 = vector.multi_reduction <add>, %11, %cst_6 [0] : vector<4x256xf32> to vector<256xf32>
    %13 = vector.shape_cast %12 : vector<256xf32> to vector<1x256xf32>
    %14 = tpu.reciprocal %13 {approx = true} : vector<1x256xf32> -> vector<1x256xf32>
    %15 = arith.mulf %13, %14 : vector<1x256xf32>
    %cst_7 = arith.constant 2.000000e+00 : f32
    %16 = vector.broadcast %cst_7 : f32 to vector<1x256xf32>
    %17 = arith.subf %16, %15 : vector<1x256xf32>
    %18 = arith.mulf %14, %17 : vector<1x256xf32>
    %19 = vector.broadcast %18 : vector<1x256xf32> to vector<4x256xf32>
    %20 = arith.mulf %11, %19 : vector<4x256xf32>
    %21 = tpu.iota {dimensions = array<i32: 0>} : vector<4x256xi32>
    %22 = vector.broadcast %6 : vector<1x256xi32> to vector<4x256xi32>
    %23 = arith.cmpi eq, %21, %22 : vector<4x256xi32>
    %cst_8 = arith.constant 0.000000e+00 : f32
    %24 = vector.broadcast %cst_8 : f32 to vector<4x256xf32>
    %c1_i32 = arith.constant 1 : i32
    %25 = arith.muli %arg0, %c1_i32 : i32
    %26 = arith.addi %25, %arg2 : i32
    %c256_i32 = arith.constant 256 : i32
    %27 = arith.muli %26, %c256_i32 : i32
    %c256_i32_9 = arith.constant 256 : i32
    %28 = arith.addi %27, %c256_i32_9 : i32
    %c256_i32_10 = arith.constant 256 : i32
    %29 = arith.cmpi sle, %28, %c256_i32_10 : i32
    %30 = arith.extui %29 : i1 to i32
    %c0_i32_11 = arith.constant 0 : i32
    %31 = arith.cmpi ne, %30, %c0_i32_11 : i32
    scf.if %31 {
      %c0_15 = arith.constant 0 : index
      %c0_16 = arith.constant 0 : index
      %38 = vector.load %arg8[%c0_15, %c0_16] : memref<4x1xf32, #tpu.memory_space<vmem>>, vector<4x1xf32>
      %39 = arith.select %23, %20, %24 : vector<4x256xi1>, vector<4x256xf32>
      %cst_17 = arith.constant dense<0.000000e+00> : vector<4xf32>
      %40 = vector.multi_reduction <add>, %39, %cst_17 [1] : vector<4x256xf32> to vector<4xf32>
      %41 = vector.shape_cast %40 : vector<4xf32> to vector<4x1xf32>
      %42 = arith.addf %38, %41 : vector<4x1xf32>
      %c0_18 = arith.constant 0 : index
      %c0_19 = arith.constant 0 : index
      %43 = vector.load %arg8[%c0_18, %c0_19] : memref<4x1xf32, #tpu.memory_space<vmem>>, vector<4x1xf32>
      tpu.vector_store %arg8[%c0_18, %c0_19], %42 {strides = array<i32>} : memref<4x1xf32, #tpu.memory_space<vmem>>, vector<4x1xf32>,
      %c0_20 = arith.constant 0 : index
      %c0_21 = arith.constant 0 : index
      %44 = vector.load %arg9[%c0_20, %c0_21] : memref<4x1xf32, #tpu.memory_space<vmem>>, vector<4x1xf32>
      %cst_22 = arith.constant dense<0.000000e+00> : vector<4xf32>
      %45 = vector.multi_reduction <add>, %20, %cst_22 [1] : vector<4x256xf32> to vector<4xf32>
      %46 = vector.shape_cast %45 : vector<4xf32> to vector<4x1xf32>
      %47 = arith.addf %44, %46 : vector<4x1xf32>
      %c0_23 = arith.constant 0 : index
      %c0_24 = arith.constant 0 : index
      %48 = vector.load %arg9[%c0_23, %c0_24] : memref<4x1xf32, #tpu.memory_space<vmem>>, vector<4x1xf32>
      tpu.vector_store %arg9[%c0_23, %c0_24], %47 {strides = array<i32>} : memref<4x1xf32, #tpu.memory_space<vmem>>, vector<4x1xf32>,
      %c0_25 = arith.constant 0 : index
      %c0_26 = arith.constant 0 : index
      %49 = vector.load %arg10[%c0_25, %c0_26] : memref<4x1xf32, #tpu.memory_space<vmem>>, vector<4x1xf32>
      %50 = arith.extui %23 : vector<4x256xi1> to vector<4x256xi32>
      %51 = arith.sitofp %50 : vector<4x256xi32> to vector<4x256xf32>
      %cst_27 = arith.constant dense<0.000000e+00> : vector<4xf32>
      %52 = vector.multi_reduction <add>, %51, %cst_27 [1] : vector<4x256xf32> to vector<4xf32>
      %53 = vector.shape_cast %52 : vector<4xf32> to vector<4x1xf32>
      %54 = arith.addf %49, %53 : vector<4x1xf32>
      %c0_28 = arith.constant 0 : index
      %c0_29 = arith.constant 0 : index
      %55 = vector.load %arg10[%c0_28, %c0_29] : memref<4x1xf32, #tpu.memory_space<vmem>>, vector<4x1xf32>
      tpu.vector_store %arg10[%c0_28, %c0_29], %54 {strides = array<i32>} : memref<4x1xf32, #tpu.memory_space<vmem>>, vector<4x1xf32>,
    } else {
    }
    %true = arith.constant true
    %32 = arith.xori %29, %true : i1
    %33 = arith.extui %32 : i1 to i32
    %c0_i32_12 = arith.constant 0 : i32
    %34 = arith.cmpi ne, %33, %c0_i32_12 : i32
    scf.if %34 {
      %38 = tpu.iota {dimensions = array<i32: 1>} : vector<1x256xi32>
      %39 = vector.broadcast %27 : i32 to vector<1x256xi32>
      %40 = arith.addi %38, %39 : vector<1x256xi32>
      %c256_i32_15 = arith.constant 256 : i32
      %41 = vector.broadcast %c256_i32_15 : i32 to vector<1x256xi32>
      %42 = arith.cmpi slt, %40, %41 : vector<1x256xi32>
      %43 = vector.broadcast %42 : vector<1x256xi1> to vector<4x256xi1>
      %44 = arith.andi %23, %43 : vector<4x256xi1>
      %c0_16 = arith.constant 0 : index
      %c0_17 = arith.constant 0 : index
      %45 = vector.load %arg8[%c0_16, %c0_17] : memref<4x1xf32, #tpu.memory_space<vmem>>, vector<4x1xf32>
      %46 = arith.select %44, %20, %24 : vector<4x256xi1>, vector<4x256xf32>
      %cst_18 = arith.constant dense<0.000000e+00> : vector<4xf32>
      %47 = vector.multi_reduction <add>, %46, %cst_18 [1] : vector<4x256xf32> to vector<4xf32>
      %48 = vector.shape_cast %47 : vector<4xf32> to vector<4x1xf32>
      %49 = arith.addf %45, %48 : vector<4x1xf32>
      %c0_19 = arith.constant 0 : index
      %c0_20 = arith.constant 0 : index
      %50 = vector.load %arg8[%c0_19, %c0_20] : memref<4x1xf32, #tpu.memory_space<vmem>>, vector<4x1xf32>
      tpu.vector_store %arg8[%c0_19, %c0_20], %49 {strides = array<i32>} : memref<4x1xf32, #tpu.memory_space<vmem>>, vector<4x1xf32>,
      %c0_21 = arith.constant 0 : index
      %c0_22 = arith.constant 0 : index
      %51 = vector.load %arg9[%c0_21, %c0_22] : memref<4x1xf32, #tpu.memory_space<vmem>>, vector<4x1xf32>
      %52 = vector.shape_cast %42 : vector<1x256xi1> to vector<1x256xi1>
      %53 = vector.broadcast %52 : vector<1x256xi1> to vector<4x256xi1>
      %54 = arith.select %53, %20, %24 : vector<4x256xi1>, vector<4x256xf32>
      %cst_23 = arith.constant dense<0.000000e+00> : vector<4xf32>
      %55 = vector.multi_reduction <add>, %54, %cst_23 [1] : vector<4x256xf32> to vector<4xf32>
      %56 = vector.shape_cast %55 : vector<4xf32> to vector<4x1xf32>
      %57 = arith.addf %51, %56 : vector<4x1xf32>
      %c0_24 = arith.constant 0 : index
      %c0_25 = arith.constant 0 : index
      %58 = vector.load %arg9[%c0_24, %c0_25] : memref<4x1xf32, #tpu.memory_space<vmem>>, vector<4x1xf32>
      tpu.vector_store %arg9[%c0_24, %c0_25], %57 {strides = array<i32>} : memref<4x1xf32, #tpu.memory_space<vmem>>, vector<4x1xf32>,
      %c0_26 = arith.constant 0 : index
      %c0_27 = arith.constant 0 : index
      %59 = vector.load %arg10[%c0_26, %c0_27] : memref<4x1xf32, #tpu.memory_space<vmem>>, vector<4x1xf32>
      %60 = arith.extui %44 : vector<4x256xi1> to vector<4x256xi32>
      %61 = arith.sitofp %60 : vector<4x256xi32> to vector<4x256xf32>
      %cst_28 = arith.constant dense<0.000000e+00> : vector<4xf32>
      %62 = vector.multi_reduction <add>, %61, %cst_28 [1] : vector<4x256xf32> to vector<4xf32>
      %63 = vector.shape_cast %62 : vector<4xf32> to vector<4x1xf32>
      %64 = arith.addf %59, %63 : vector<4x1xf32>
      %c0_29 = arith.constant 0 : index
      %c0_30 = arith.constant 0 : index
      %65 = vector.load %arg10[%c0_29, %c0_30] : memref<4x1xf32, #tpu.memory_space<vmem>>, vector<4x1xf32>
      tpu.vector_store %arg10[%c0_29, %c0_30], %64 {strides = array<i32>} : memref<4x1xf32, #tpu.memory_space<vmem>>, vector<4x1xf32>,
    } else {
    }
    %c0_i32_13 = arith.constant 0 : i32
    %35 = arith.cmpi eq, %arg2, %c0_i32_13 : i32
    %36 = arith.extui %35 : i1 to i32
    %c0_i32_14 = arith.constant 0 : i32
    %37 = arith.cmpi ne, %36, %c0_i32_14 : i32
    scf.if %37 {
      %c0_15 = arith.constant 0 : index
      %c0_16 = arith.constant 0 : index
      %38 = vector.load %arg8[%c0_15, %c0_16] : memref<4x1xf32, #tpu.memory_space<vmem>>, vector<4x1xf32>
      %39 = vector.shape_cast %38 : vector<4x1xf32> to vector<1x1x4x1xf32>
      %c0_17 = arith.constant 0 : index
      %c0_18 = arith.constant 0 : index
      %c0_19 = arith.constant 0 : index
      %c0_20 = arith.constant 0 : index
      %40 = vector.load %arg5[%c0_17, %c0_18, %c0_19, %c0_20] : memref<1x1x4x1xf32, #tpu.memory_space<vmem>>, vector<1x1x4x1xf32>
      tpu.vector_store %arg5[%c0_17, %c0_18, %c0_19, %c0_20], %39 {strides = array<i32>} : memref<1x1x4x1xf32, #tpu.memory_space<vmem>>, vector<1x1x4x1xf32>,
      %c0_21 = arith.constant 0 : index
      %c0_22 = arith.constant 0 : index
      %41 = vector.load %arg9[%c0_21, %c0_22] : memref<4x1xf32, #tpu.memory_space<vmem>>, vector<4x1xf32>
      %42 = vector.shape_cast %41 : vector<4x1xf32> to vector<1x1x4x1xf32>
      %c0_23 = arith.constant 0 : index
      %c0_24 = arith.constant 0 : index
      %c0_25 = arith.constant 0 : index
      %c0_26 = arith.constant 0 : index
      %43 = vector.load %arg6[%c0_23, %c0_24, %c0_25, %c0_26] : memref<1x1x4x1xf32, #tpu.memory_space<vmem>>, vector<1x1x4x1xf32>
      tpu.vector_store %arg6[%c0_23, %c0_24, %c0_25, %c0_26], %42 {strides = array<i32>} : memref<1x1x4x1xf32, #tpu.memory_space<vmem>>, vector<1x1x4x1xf32>,
      %c0_27 = arith.constant 0 : index
      %c0_28 = arith.constant 0 : index
      %44 = vector.load %arg10[%c0_27, %c0_28] : memref<4x1xf32, #tpu.memory_space<vmem>>, vector<4x1xf32>
      %45 = vector.shape_cast %44 : vector<4x1xf32> to vector<1x1x4x1xf32>
      %c0_29 = arith.constant 0 : index
      %c0_30 = arith.constant 0 : index
      %c0_31 = arith.constant 0 : index
      %c0_32 = arith.constant 0 : index
      %46 = vector.load %arg7[%c0_29, %c0_30, %c0_31, %c0_32] : memref<1x1x4x1xf32, #tpu.memory_space<vmem>>, vector<1x1x4x1xf32>
      tpu.vector_store %arg7[%c0_29, %c0_30, %c0_31, %c0_32], %45 {strides = array<i32>} : memref<1x1x4x1xf32, #tpu.memory_space<vmem>>, vector<1x1x4x1xf32>,
    } else {
    }
    return
  }
  func.func @transform_0(%arg0: i32, %arg1: i32, %arg2: i32) -> (i32, i32, i32) {
    %c1_i32 = arith.constant 1 : i32
    %0 = arith.muli %arg0, %c1_i32 : i32
    %1 = arith.addi %0, %arg2 : i32
    %c0_i32 = arith.constant 0 : i32
    %2 = arith.minsi %1, %c0_i32 : i32
    %c0_i32_0 = arith.constant 0 : i32
    %c0_i32_1 = arith.constant 0 : i32
    return %arg1, %c0_i32_0, %2 : i32, i32, i32
  }
  func.func @transform_1(%arg0: i32, %arg1: i32, %arg2: i32) -> (i32, i32, i32) {
    %c1_i32 = arith.constant 1 : i32
    %0 = arith.muli %arg0, %c1_i32 : i32
    %1 = arith.addi %0, %arg2 : i32
    %c0_i32 = arith.constant 0 : i32
    %2 = arith.minsi %1, %c0_i32 : i32
    %c0_i32_0 = arith.constant 0 : i32
    %c0_i32_1 = arith.constant 0 : i32
    return %arg1, %c0_i32_0, %2 : i32, i32, i32
  }
  func.func @transform_2(%arg0: i32, %arg1: i32, %arg2: i32) -> (i32, i32, i32, i32) {
    %c0_i32 = arith.constant 0 : i32
    %c0_i32_0 = arith.constant 0 : i32
    %c0_i32_1 = arith.constant 0 : i32
    return %arg0, %arg1, %c0_i32, %c0_i32_0 : i32, i32, i32, i32
  }
  func.func @transform_3(%arg0: i32, %arg1: i32, %arg2: i32) -> (i32, i32, i32, i32) {
    %c0_i32 = arith.constant 0 : i32
    %c0_i32_0 = arith.constant 0 : i32
    %c0_i32_1 = arith.constant 0 : i32
    return %arg0, %arg1, %c0_i32, %c0_i32_0 : i32, i32, i32, i32
  }
  func.func @transform_4(%arg0: i32, %arg1: i32, %arg2: i32) -> (i32, i32, i32, i32) {
    %c0_i32 = arith.constant 0 : i32
    %c0_i32_0 = arith.constant 0 : i32
    %c0_i32_1 = arith.constant 0 : i32
    return %arg0, %arg1, %c0_i32, %c0_i32_0 : i32, i32, i32, i32
  }
}

</mosaic_0001>

<bundles_post_ra>
// kernel: tpu_custom_call.1
= control target key start
LH: loop header
LB: loop body
LE: loop exit
PB: predicated region body
PF: predicated region fallthrough
CT: control target
= control target key end

     0   :  { %10 = vsyncpa [#allocation6], 0  ;;  %s1154_s0 = inlined_call_operand.hbm [shape: f32[2,4,256], index: 0, kind: input, shape index: {}]   ;;  %s1155_s1 = inlined_call_operand.hbm [shape: s32[2,1,256], index: 1, kind: input, shape index: {}]   ;;  %s1156_s2 = inlined_call_operand.vmem [shape: f32[1,2,4,1], index: 2, kind: output, shape index: {0}]   ;;  %s1157_s3 = inlined_call_operand.vmem [shape: f32[1,2,4,1], index: 3, kind: output, shape index: {1}]   ;;  %s1158_s4 = inlined_call_operand.vmem [shape: f32[1,2,4,1], index: 4, kind: output, shape index: {2}]  }
   0x1   :  { %12 = vsyncpa [#allocation6 + $0x1], 0 }
   0x2   :  { %13 = vsyncpa [#allocation8], 0 }
   0x3   :  { %15 = vsyncpa [#allocation8 + $0x1], 0  ;;  %s1004_s15 = smov 0   ;;  %s1006_s16 = smov 0  }
   0x4   :  { %s1008_s17 = smov 0   ;;  %s1010_s18 = smov 0  }
   0x5   :  { %s1012_s19 = smov 0   ;;  %s1014_s20 = smov 0  }
   0x6 LB: > { %s773_s21 = sadd.s32 4294967295, %s976_s20   ;;  %s36_s22 = sadd.s32 1, %s972_s19  ;;  %s976_s20 = sphi %s1014_s20, %s21_s20   ;;  %s972_s19 = sphi %s1012_s19, %s1170_s19   ;;  %s968_s18 = sphi %s1010_s18, %s1169_s18   ;;  %s964_s17 = sphi %s1008_s17, %s1168_s17   ;;  %s960_s16 = sphi %s1006_s16, %s1167_s16   ;;  %s956_s15 = sphi %s1004_s15, %s1166_s15  }
   0x7   : > { %p38_p0 = scmp.ge.s32.totalorder %s36_s22, 2  ;;  %s55_s23 = sadd.s32 1, %s964_s17 }
   0x8   : > { %p62_p1 = scmp.ne.s32.totalorder %s964_s17, %s960_s16  ;;  %p63_p2 = scmp.eq.s32.totalorder %s976_s20, 0 }
   0x9   : > { %s1172_s22 = smov (%p38_p0, %s36_s22), 0  ;;  %p68_p4 = scmp.ne.s32.totalorder %s960_s16, %s956_s15 }
   0xa   : > { %p1040_p3 = por %p63_p2, %p62_p1  ;;  %s50_s25 = ssub.s32 %s972_s19, %s1172_s22 }
   0xb   : > { %p69_p5 = scmp.eq.s32.totalorder %s773_s21, 0  ;;  %p53_p6 = scmp.eq.s32.totalorder %s50_s25, 0 }
   0xc   : > { %p806_p8 = scmp.lt.s32.totalorder %s976_s20, 2  ;;  %s210_s28 = sand.u32 1, %s964_s17  }
   0xd   : > { %p1047_p7 = por %p69_p5, %p68_p4  ;;  %s794_s29 = sshll.u32 %s972_s19, 3 }
   0xe   : > { %s1053_s27 = scalar_select %p53_p6, %s964_s17, %s55_s23  }
   0xf   : > { %s777_s30 = sshll.u32 %s210_s28, 3  ;;  %s224_s7 = scalar_lea.hbm %s1154_s0, %s794_s29 }
  0x10   : > { %s226_s8 = sshll.u32 %s224_s7, 4  ;;  %s214_s9 = scalar_lea.vmem [#allocation5], %s777_s30  ;;  %s227_s8 = int_to_ptr.hbm [resolvable:$true] %s226_s8 }
  0x11   : > { %s228_s10 = sshll.u32 %s214_s9, 4  ;;  %p1062_p9 = pnand %p806_p8, %p1040_p3  ;;  %s229_s10 = int_to_ptr.vmem [resolvable:$true] %s228_s10 }
  0x12   : > { %p782_p10 = scmp.ge.s32.totalorder %s976_s20, 1  ;;  %p257_p11 = scmp.lt.s32.totalorder %s976_s20, 3 }
  0x13   : > { %s780_s12 = sshll.u32 %s210_s28, 1  ;;  %s211_s13 = scalar_lea.sflag [#allocation6], %s210_s28 }
  0x14   : > { %802 = dma.hbm_to_vmem [thread:$0]  (!%p1062_p9), %s227_s8, 128, %s229_s10, %s211_s13  }
  0x15   : > { %p258_p12 = pnand %p782_p10, %p257_p11  ;;  %s781_s14 = sshll.u32 %s972_s19, 1 }
  0x16   : > { %s239_s15 = scalar_lea.vmem [#allocation7], %s780_s12  ;;  %s248_s24 = scalar_lea.hbm %s1155_s1, %s781_s14 }
  0x17   : > { %s252_s21 = sshll.u32 %s239_s15, 4  ;;  %s250_s29 = sshll.u32 %s248_s24, 4  ;;  %s253_s21 = int_to_ptr.vmem [resolvable:$true] %s252_s21  ;;  %s251_s29 = int_to_ptr.hbm [resolvable:$true] %s250_s29 }
  0x18   : > { %s236_s30 = scalar_lea.sflag [#allocation8], %s210_s28  ;;  %261 = sbr.rel (%p258_p12) target bundleno = 257 (0x101), region = 28 }
  0x19   : > { %805 = dma.hbm_to_vmem [thread:$0]  (!%p1062_p9), %s251_s29, 32, %s253_s21, %s236_s30  }
  0x1a   : > { %s263_s5 = sand.u32 (!%p258_p12), 1, %s960_s16  }
  0x1b   : > { %s783_s6 = sshll.u32 (!%p258_p12), %s263_s5, 3  ;;  %s264_s7 = scalar_lea.sflag (!%p258_p12), [#allocation6], %s263_s5 }
  0x1c   : > { %s267_s8 = scalar_lea.vmem (!%p258_p12), [#allocation5], %s783_s6 }
  0x1d   : > { %947 = dma.done.wait (%p1047_p7), %s264_s7, 128  }
  0x1e   : > { %949 = vsyncadd (%p1047_p7), %s264_s7, 4294967168  ;;  %s784_s9 = sshll.u32 %s263_s5, 1  ;;  %s274_s10 = scalar_lea.sflag [#allocation8], %s263_s5 }
  0x1f   : > { %s1081_s12 = scalar_lea.vmem [#allocation7], %s784_s9 }
  0x20   : > { %951 = dma.done.wait (%p1047_p7), %s274_s10, 32  }
  0x21   : > { %953 = vsyncadd (%p1047_p7), %s274_s10, 4294967264  ;;  %v367_v0 = vld [vmem:[%s267_s8] sm:$0xff]  ;;  %vm375_vm0 = vcmask 1043456   ;;  %v432_v30 = vlaneseq  ;;  %v368_v31 = vld [vmem:[%s1081_s12] sm:$0x3]  ;;  %v978_v45 = vmov 0.0  }
  0x22   : > { %370 = vst [vmem:[#allocation1] ss:$2 sm:$0xff] %v367_v0  ;;  %v434_v37 = vperm.slane %v368_v31, 0  ;;  %v435_v38 = vperm.slane %v368_v31, 1  ;;  %vm363_vm3 = vcmask 3072   ;;  %p337_p13 = scmp.lt.s32.totalorder %s968_s18, 1 }
  0x23   : > { %v433_v36 = vshrl.u32 %v432_v30, 7  ;;  %364 = vst.msk [vmem:[#allocation2] sm:$0xf] %vm363_vm3, %v978_v45 }
  0x24   : > { %365 = vst.msk [vmem:[#allocation3] sm:$0xf] %vm363_vm3, %v978_v45  ;;  %s1174_s18 = smov (!%p337_p13, %s968_s18), 1 }
  0x25   : > { %vm1093_vm1 = vcmp.eq.s32.totalorder %v433_v36, %v434_v37  ;;  %vm1097_vm2 = vcmp.eq.s32.totalorder %v433_v36, %v435_v38  ;;  %366 = vst.msk [vmem:[#allocation4] sm:$0xf] %vm363_vm3, %v978_v45  ;;  %s785_s26 = sshll.u32 %s1174_s18, 2 }
  0x26   : > { %v788_v46 = vsel %vm1093_vm1, 1.0, %v978_v45  ;;  %v789_v47 = vsel %vm1097_vm2, 1.0, %v978_v45  ;;  %s358_s13 = scalar_lea.vmem %s1158_s4, %s785_s26  ;;  %s342_s21 = scalar_lea.vmem %s1156_s2, %s785_s26 }
  0x27   : > { %v480_v48 = vsel %vm375_vm0, %v788_v46, 0.0  ;;  %v481_v49 = vsel %vm375_vm0, %v789_v47, 0.0  ;;  %s350_s25 = scalar_lea.vmem %s1157_s3, %s785_s26 }
  0x28   : > { %v482_v50 = vadd.f32 %v481_v49, %v480_v48 }
  0x29   : > { %v371_v1 = vld.sshfl [vmem:[#allocation1] sm:$0xff pattern:$0x75316420]  ;;  %v372_v2 = vld.sshfl [vmem:[#allocation1 + $0x8] sm:$0xff pattern:$0x75316420] }
  0x2a   : > { %v376_v3 = vsel %vm375_vm0, %v371_v1, -inf  ;;  %v383_v4 = vsel %vm375_vm0, %v372_v2, -inf  ;;  %483 = vadd.xlane.f32.xlu1 %v482_v50 }
  0x2b   : > { %v377_v5 = vrot.slane %v376_v3, 4  ;;  %v384_v6 = vrot.slane %v383_v4, 4 }
  0x2d   : > { %v378_v7 = vmax.f32 %v376_v3, %v377_v5  ;;  %v385_v8 = vmax.f32 %v383_v4, %v384_v6 }
  0x2f   : > { %v379_v9 = vrot.slane %v378_v7, 2  ;;  %v386_v10 = vrot.slane %v385_v8, 2 }
  0x31   : > { %v380_v11 = vmax.f32 %v378_v7, %v379_v9  ;;  %v387_v12 = vmax.f32 %v385_v8, %v386_v10 }
  0x33   : > { %v381_v13 = vrot.slane %v380_v11, 1  ;;  %v388_v14 = vrot.slane %v387_v12, 1 }
  0x35   : > { %v382_v15 = vmax.f32 %v380_v11, %v381_v13  ;;  %v389_v16 = vmax.f32 %v387_v12, %v388_v14  ;;  %v475_v11 = vld [vmem:[#allocation4] sm:$0xf]  ;;  %v445_v14 = vld [vmem:[#allocation2] sm:$0xf] }
  0x37   : > { %v392_v17 = vrot.slane %v389_v16, 4 }
  0x39   : > { %v393_v18 = vsel %vm375_vm0, %v382_v15, %v392_v17  ;;  %v462_v17 = vld [vmem:[#allocation3] sm:$0xf] }
  0x3a   : > { %v395_v19 = vsub.f32 %v367_v0, %v393_v18 }
  0x3c   : > { %v396_v20 = vmul.f32 1.442695, %v395_v19 }
  0x3e   : > { %856 = vpow2.f32 %v396_v20 }
  0x44   : > { %v857_v21 = vpop.eup %856 }
  0x45   : > { %399 = vst [vmem:[#allocation1] ss:$2 sm:$0xff] %v857_v21 }
  0x4c   : > { %v400_v22 = vld.sshfl [vmem:[#allocation1] sm:$0xff pattern:$0x75316420]  ;;  %v401_v23 = vld.sshfl [vmem:[#allocation1 + $0x8] sm:$0xff pattern:$0x75316420] }
  0x4d   : > { %v404_v24 = vsel %vm375_vm0, %v400_v22, 0.0  ;;  %v411_v25 = vsel %vm375_vm0, %v401_v23, 0.0 }
  0x4e   : > { %v405_v26 = vrot.slane %v404_v24, 4  ;;  %v412_v27 = vrot.slane %v411_v25, 4 }
  0x50   : > { %v406_v28 = vadd.f32 %v405_v26, %v404_v24  ;;  %v413_v29 = vadd.f32 %v412_v27, %v411_v25 }
  0x52   : > { %v407_v32 = vrot.slane %v406_v28, 2  ;;  %v414_v33 = vrot.slane %v413_v29, 2 }
  0x54   : > { %v408_v34 = vadd.f32 %v407_v32, %v406_v28  ;;  %v415_v35 = vadd.f32 %v414_v33, %v413_v29 }
  0x56   : > { %v409_v39 = vrot.slane %v408_v34, 1  ;;  %v416_v40 = vrot.slane %v415_v35, 1 }
  0x58   : > { %v410_v41 = vadd.f32 %v409_v39, %v408_v34  ;;  %v417_v42 = vadd.f32 %v416_v40, %v415_v35 }
  0x5a   : > { %858 = vrcp.f32 %v410_v41 }
  0x5b   : > { %860 = vrcp.f32 %v417_v42 }
  0x60   : > { %v859_v51 = vpop.eup %858 }
  0x61   : > { %v861_v52 = vpop.eup %860  ;;  %v420_v53 = vmul.f32 %v859_v51, %v410_v41 }
  0x62   : > { %v421_v54 = vmul.f32 %v861_v52, %v417_v42 }
  0x63   : > { %v422_v55 = vsub.f32 2.0, %v420_v53 }
  0x64   : > { %v423_v56 = vsub.f32 2.0, %v421_v54 }
  0x65   : > { %v424_v57 = vmul.f32 %v859_v51, %v422_v55 }
  0x66   : > { %v425_v58 = vmul.f32 %v861_v52, %v423_v56 }
  0x68   : > { %v428_v59 = vrot.slane %v425_v58, 4 }
  0x6a   : > { %v429_v60 = vsel %vm375_vm0, %v424_v57, %v428_v59 }
  0x6b   : > { %v431_v61 = vmul.f32 %v857_v21, %v429_v60 }
  0x6d   : > { %447 = vst [vmem:[#allocation1] ss:$2 sm:$0xff] %v431_v61 }
  0x74   : > { %v448_v62 = vld.sshfl [vmem:[#allocation1] sm:$0xff pattern:$0x75316420]  ;;  %v449_v63 = vld.sshfl [vmem:[#allocation1 + $0x8] sm:$0xff pattern:$0x75316420] }
  0x75   : > { %v452_v0 = vsel %vm1093_vm1, %v448_v62, 0.0  ;;  %v453_v1 = vsel %vm1097_vm2, %v449_v63, 0.0  ;;  %463 = vst [vmem:[#allocation1] ss:$2 sm:$0xff] %v431_v61 }
  0x76   : > { %v454_v2 = vsel %vm375_vm0, %v452_v0, 0.0  ;;  %v455_v3 = vsel %vm375_vm0, %v453_v1, 0.0 }
  0x77   : > { %v456_v4 = vadd.f32 %v455_v3, %v454_v2 }
  0x79   : > { %457 = vadd.xlane.f32.xlu0 %v456_v4 }
  0x7c   : > { %v464_v5 = vld.sshfl [vmem:[#allocation1] sm:$0xff pattern:$0x75316420]  ;;  %v465_v6 = vld.sshfl [vmem:[#allocation1 + $0x8] sm:$0xff pattern:$0x75316420] }
  0x7d   : > { %v468_v7 = vsel %vm375_vm0, %v464_v5, 0.0  ;;  %v469_v8 = vsel %vm375_vm0, %v465_v6, 0.0 }
  0x7e   : > { %v470_v9 = vadd.f32 %v469_v8, %v468_v7 }
  0x81   : > { %471 = vadd.xlane.f32.xlu0 %v470_v9 }
  0x9d   : > { %v484_v10 = vpop.xlane.xlu1 %483 }
  0x9e   : > { %v485_v12 = vadd.f32 %v484_v10, %v475_v11 }
  0xa0   : > { %486 = vst.msk [vmem:[#allocation4] sm:$0xf] %vm363_vm3, %v485_v12 }
  0xa7   : > { %v557_v13 = vld [vmem:[#allocation4] sm:$0xf] }
  0xa8   : > { %558 = vst.msk [vmem:[%s358_s13] sm:$0xf] %vm363_vm3, %v557_v13 }
  0xec   : > { %v458_v15 = vpop.xlane.xlu0 %457 }
  0xed   : > { %v459_v16 = vadd.f32 %v458_v15, %v445_v14 }
  0xef   : > { %461 = vst.msk [vmem:[#allocation2] sm:$0xf] %vm363_vm3, %v459_v16 }
  0xf4   : > { %v472_v18 = vpop.xlane.xlu0 %471 }
  0xf5   : > { %v473_v19 = vadd.f32 %v472_v18, %v462_v17 }
  0xf6   : > { %v552_v20 = vld [vmem:[#allocation2] sm:$0xf] }
  0xf7   : > { %554 = vst.msk [vmem:[%s342_s21] sm:$0xf] %vm363_vm3, %v552_v20 }
  0xf8   : > { %474 = vst.msk [vmem:[#allocation3] sm:$0xf] %vm363_vm3, %v473_v19 }
  0xff   : > { %v555_v21 = vld [vmem:[#allocation3] sm:$0xf] }
 0x100   : > { %556 = vst.msk [vmem:[%s350_s25] sm:$0xf] %vm363_vm3, %v555_v21 }
 0x101 PF: > { %s21_s20 = sadd.s32 1, %s976_s20   ;;  %s1166_s15 = smov %s960_s16 }
 0x102   : > { %p18_p0 = scmp.ge.s32.totalorder %s21_s20, 4   ;;  %s1167_s16 = smov %s964_s17 }
 0x103   : > { %s1168_s17 = smov %s1053_s27  ;;  %s1169_s18 = smov %s972_s19 }
 0x104   : > { %s1170_s19 = smov %s1172_s22  ;;  %20 = sbr.rel (!%p18_p0) target bundleno = 6 (0x6), region = 121 }
 0x109   :  { %630 = vsyncpa [#allocation6], 1 }
 0x10a   :  { %632 = vsyncpa [#allocation6 + $0x1], 1 }
 0x10b   :  { %633 = vsyncpa [#allocation8], 1 }
 0x10c   :  { %635 = vsyncpa [#allocation8 + $0x1], 1 }

</bundles_post_ra>
